<compile_context>
chip_gen: v5e
topology: v5e:2x2
jax: 0.10.0
libtpu: 0.0.40
codegen_flags: <defaults>
</compile_context>

<pallas_src>
import jax
import jax.numpy as jnp
from jax.experimental import pallas as pl
from jax.experimental.pallas import tpu as pltpu


def _make_conv1x1_act_kernel(N, Cin, Cout, HpWp):
    inv6 = 1.0 / 6.0

    def kernel(x_ref, w_ref, b_ref, o_ref):
        # x_ref: (N, Cin,  HpWp) VMEM f32 -- zero-padded images, spatial flattened (lane-dense)
        # w_ref: (Cout, Cin)     VMEM f32 -- 1x1 conv weight
        # b_ref: (Cout, 1)       VMEM f32 -- conv bias (column, broadcasts over lanes)
        # o_ref: (N, Cout, HpWp) VMEM f32 -- final output, spatial flattened
        w = w_ref[...]
        b3 = b_ref[...] + 3.0                     # bias + 3, hoisted once
        for n in range(N):                         # static unroll, N is tiny
            # (Cout, Cin) @ (Cin, HpWp) -> (Cout, HpWp) on the MXU
            y = jnp.dot(w, x_ref[n], preferred_element_type=jnp.float32)
            # max(max(v, 0), 6) / 6  ==  max(v, 6) / 6   (literal torch semantics)
            o_ref[n] = jnp.maximum(y + b3, 6.0) * inv6

    return kernel


def model_forward(x_nchw, weight, bias):
    """x_nchw: (N, Cin, H, W) f32.  weight: (Cout, Cin[,1,1]).  bias: (Cout,).

    Returns (N, Cout, H+2, W+2) f32, matching Conv2d(Cin, Cout, 1, stride=1,
    padding=1) followed by +3, min-clamp(0), min-clamp(6), /6.
    """
    N, Cin, H, W = x_nchw.shape
    Cout = weight.shape[0]
    Hp, Wp = H + 2, W + 2
    HpWp = Hp * Wp

    # One pad HLO (the conv's zero ring), then contiguous (free) reshapes only.
    xp = jnp.pad(x_nchw.astype(jnp.float32), ((0, 0), (0, 0), (1, 1), (1, 1)))
    xp_flat = xp.reshape(N, Cin, HpWp)
    w2 = weight.reshape(Cout, Cin).astype(jnp.float32)
    b2 = bias.reshape(Cout, 1).astype(jnp.float32)

    out_flat = pl.pallas_call(
        _make_conv1x1_act_kernel(N, Cin, Cout, HpWp),
        out_shape=jax.ShapeDtypeStruct((N, Cout, HpWp), jnp.float32),
        # No grid: one kernel invocation, everything resident in VMEM.
        in_specs=[
            pl.BlockSpec(memory_space=pltpu.MemorySpace.VMEM),
            pl.BlockSpec(memory_space=pltpu.MemorySpace.VMEM),
            pl.BlockSpec(memory_space=pltpu.MemorySpace.VMEM),
        ],
        out_specs=pl.BlockSpec(memory_space=pltpu.MemorySpace.VMEM),
    )(xp_flat, w2, b2)

    return out_flat.reshape(N, Cout, Hp, Wp)   # contiguous reshape back (free)


if __name__ == "__main__":
    key = jax.random.PRNGKey(0)
    kx, kw, kb = jax.random.split(key, 3)

    # Shapes implied by the module: x = randn(1, 3, 64, 64), Conv2d(3 -> 8, k=1, pad=1)
    N, Cin, H, W, Cout = 1, 3, 64, 64, 8
    x = jax.random.normal(kx, (N, Cin, H, W), dtype=jnp.float32)

    # deterministic parameter init (mimic PyTorch kaiming-uniform bounds for 1x1 conv)
    fan_in = float(Cin)
    bound = 1.0 / (fan_in ** 0.5)
    weight = jax.random.uniform(kw, (Cout, Cin), jnp.float32, -bound, bound)
    bias = jax.random.uniform(kb, (Cout,), jnp.float32, -bound, bound)

    out = jax.jit(model_forward)(x, weight, bias)
    jax.block_until_ready(out)
    assert out.shape == (N, Cout, H + 2, W + 2), out.shape

    # pure-JAX reference with the literal (min-only) clamp semantics
    xpad = jnp.pad(x, ((0, 0), (0, 0), (1, 1), (1, 1)))
    conv = jnp.einsum("oc,nchw->nohw", weight, xpad) + bias[None, :, None, None]
    ref = jnp.maximum(jnp.maximum(conv + 3.0, 0.0), 6.0) / 6.0
    assert jnp.allclose(out, ref, atol=1e-5, rtol=1e-5), float(
        jnp.max(jnp.abs(out - ref)))

    print("KERNEL_OK")
</pallas_src>

<mosaic_0001>
module attributes {stable_mosaic.version = 11 : i64} {
  func.func @kernel(%arg0: memref<1x3x4356xf32, #tpu.memory_space<vmem>>, %arg1: memref<8x3xf32, #tpu.memory_space<vmem>>, %arg2: memref<8x1xf32, #tpu.memory_space<vmem>>, %arg3: memref<1x8x4356xf32, #tpu.memory_space<vmem>>) attributes {dimension_semantics = [], scalar_prefetch = 0 : i64, scratch_operands = 0 : i64, tpu.core_type = #tpu.core_type<tc>} {
    %c0 = arith.constant 0 : index
    %c0_0 = arith.constant 0 : index
    %0 = vector.load %arg1[%c0, %c0_0] : memref<8x3xf32, #tpu.memory_space<vmem>>, vector<8x3xf32>
    %c0_1 = arith.constant 0 : index
    %c0_2 = arith.constant 0 : index
    %1 = vector.load %arg2[%c0_1, %c0_2] : memref<8x1xf32, #tpu.memory_space<vmem>>, vector<8x1xf32>
    %cst = arith.constant 3.000000e+00 : f32
    %2 = vector.broadcast %cst : f32 to vector<8x1xf32>
    %3 = arith.addf %1, %2 : vector<8x1xf32>
    %c0_3 = arith.constant 0 : index
    %c0_4 = arith.constant 0 : index
    %c0_5 = arith.constant 0 : index
    %4 = vector.load %arg0[%c0_3, %c0_4, %c0_5] : memref<1x3x4356xf32, #tpu.memory_space<vmem>>, vector<1x3x4356xf32>
    %5 = vector.shape_cast %4 : vector<1x3x4356xf32> to vector<3x4356xf32>
    %cst_6 = arith.constant dense<0.000000e+00> : vector<8x4356xf32>
    %6 = tpu.matmul %0, %5, %cst_6 {dimension_numbers = #tpu.dot_dimension_numbers<[1], [0], [0], [1], [0, 0, 1, 1], [], []>} : vector<8x3xf32>, vector<3x4356xf32>, vector<8x4356xf32> -> vector<8x4356xf32>
    %7 = vector.broadcast %3 : vector<8x1xf32> to vector<8x4356xf32>
    %8 = arith.addf %6, %7 : vector<8x4356xf32>
    %cst_7 = arith.constant 6.000000e+00 : f32
    %9 = vector.broadcast %cst_7 : f32 to vector<8x4356xf32>
    %10 = arith.maximumf %8, %9 : vector<8x4356xf32>
    %cst_8 = arith.constant 0.166666672 : f32
    %11 = vector.broadcast %cst_8 : f32 to vector<8x4356xf32>
    %12 = arith.mulf %10, %11 : vector<8x4356xf32>
    %c0_9 = arith.constant 0 : index
    %c0_10 = arith.constant 0 : index
    %c0_11 = arith.constant 0 : index
    %13 = vector.load %arg3[%c0_9, %c0_10, %c0_11] : memref<1x8x4356xf32, #tpu.memory_space<vmem>>, vector<1x8x4356xf32>
    %14 = vector.shape_cast %13 : vector<1x8x4356xf32> to vector<8x4356xf32>
    %15 = vector.shape_cast %12 : vector<8x4356xf32> to vector<1x8x4356xf32>
    tpu.vector_store %arg3[%c0_9, %c0_10, %c0_11], %15 {strides = array<i32>} : memref<1x8x4356xf32, #tpu.memory_space<vmem>>, vector<1x8x4356xf32>,
    return
  }
}

</mosaic_0001>

<bundles_post_ra>
// kernel: model_forward.1
= control target key start
LH: loop header
LB: loop body
LE: loop exit
PB: predicated region body
PF: predicated region fallthrough
CT: control target
= control target key end

     0   :  { %v1071_v2 = vmov 0   ;;  %vm118_vm0 = vcmask 1042432   ;;  %vm114_vm1 = vcmask 23552   ;;  %vm993_vm2 = vcmask 31744   ;;  %s1401_s0 = inlined_call_operand.vmem [shape: f32[1,3,4356], index: 0, kind: input, shape index: {}]   ;;  %s1402_s2 = inlined_call_operand.vmem [shape: f32[8,1], index: 2, kind: input, shape index: {}]   ;;  %s1403_s1 = inlined_call_operand.vmem [shape: f32[8,3], index: 1, kind: input, shape index: {}]   ;;  %s1404_s3 = inlined_call_operand.vmem [shape: f32[1,8,4356], index: 3, kind: output, shape index: {}]  }
   0x1   :  { %v18_v0 = vld [vmem:[%s1401_s0 + $0x8] sm:$0x77]  ;;  %v20_v1 = vld [vmem:[%s1401_s0 + $0x18] sm:$0x77]  ;;  %1070 = vset.pattern.permute.xlu0 %v1071_v2  ;;  %v17_v3 = vld [vmem:[%s1401_s0] sm:$0x77] }
   0x2   :  { %60 = vst [vmem:[#allocation1 + $0x10] ss:$2 sm:$0xff] %v18_v0  ;;  %v19_v4 = vld [vmem:[%s1401_s0 + $0x10] sm:$0x77]  ;;  %v15_v5 = vld [vmem:[%s1402_s2] sm:$0xff] }
   0x3   :  { %64 = vst [vmem:[#allocation1 + $0x30] ss:$2 sm:$0xff] %v20_v1  ;;  %v22_v6 = vld [vmem:[%s1401_s0 + $0x28] sm:$0x77]  ;;  %v16_v7 = vadd.f32 3.0, %v15_v5  ;;  %v1113_v8 = vld [vmem:[%s1403_s1] sm:$0xff] }
   0x4   :  { %58 = vst [vmem:[#allocation1] ss:$2 sm:$0xff] %v17_v3  ;;  %v21_v9 = vld [vmem:[%s1401_s0 + $0x20] sm:$0x77]  ;;  %v23_v11 = vld [vmem:[%s1401_s0 + $0x30] sm:$0x77] }
   0x5   :  { %62 = vst [vmem:[#allocation1 + $0x20] ss:$2 sm:$0xff] %v19_v4  ;;  %37 = vperm.xlu0 %1070, %v16_v7   ;;  %v24_v14 = vld [vmem:[%s1401_s0 + $0x38] sm:$0x77]  ;;  %v26_v20 = vld [vmem:[%s1401_s0 + $0x48] sm:$0x77] }
   0x6   :  { %v25_v21 = vld [vmem:[%s1401_s0 + $0x40] sm:$0x77]  ;;  %v27_v24 = vld [vmem:[%s1401_s0 + $0x50] sm:$0x77]  ;;  %v28_v27 = vld [vmem:[%s1401_s0 + $0x58] sm:$0x77] }
   0x7   :  { %v30_v32 = vld [vmem:[%s1401_s0 + $0x68] sm:$0x77]  ;;  %v29_v33 = vld [vmem:[%s1401_s0 + $0x60] sm:$0x77]  ;;  %v31_v36 = vld [vmem:[%s1401_s0 + $0x70] sm:$0x77] }
   0x8   :  { %v32_v39 = vld [vmem:[%s1401_s0 + $0x78] sm:$0x77]  ;;  %v34_v42 = vld [vmem:[%s1401_s0 + $0x88] sm:$0x7]  ;;  %v33_v45 = vld [vmem:[%s1401_s0 + $0x80] sm:$0x77] }
   0x9   :  { %v67_v10 = vld.sshfl [vmem:[#allocation1 + $0x10] sm:$0xff pattern:$0x75316420]  ;;  %v68_v12 = vld.sshfl [vmem:[#allocation1 + $0x18] sm:$0xff pattern:$0x75316420] }
   0xa   :  { %1003 = vmatpush.msk.msra.mxu2 %vm118_vm0, %v67_v10  ;;  %v71_v13 = vld.sshfl [vmem:[#allocation1 + $0x30] sm:$0xff pattern:$0x75316420]  ;;  %74 = vst [vmem:[#allocation1 + $0x10] ss:$2 sm:$0xff] %v22_v6  ;;  %1005 = vmatpush.msk.msra.mxu3 %vm118_vm0, %v68_v12 }
   0xb   :  { %1004 = vmatmul.msk.f32.vlgmr.msra.gmra.mxu2 %vm114_vm1, %v1113_v8  ;;  %v65_v15 = vld.sshfl [vmem:[#allocation1] sm:$0xff pattern:$0x75316420]  ;;  %v66_v16 = vld.sshfl [vmem:[#allocation1 + $0x8] sm:$0xff pattern:$0x75316420]  ;;  %1006 = vmatmul.msk.f32.vlgmr.msra.gmra.mxu3 %vm114_vm1, %v1113_v8 }
   0xc   :  { %1011 = vmatpush.msk.msrb.mxu2 %vm118_vm0, %v71_v13  ;;  %999 = vmatpush.msk.msra.mxu0 %vm118_vm0, %v65_v15  ;;  %73 = vst [vmem:[#allocation1] ss:$2 sm:$0xff] %v21_v9  ;;  %v69_v17 = vld.sshfl [vmem:[#allocation1 + $0x20] sm:$0xff pattern:$0x75316420] }
   0xd   :  { %1001 = vmatpush.msk.msra.mxu1 %vm118_vm0, %v66_v16  ;;  %1000 = vmatmul.msk.f32.vlgmr.msra.gmra.mxu0 %vm114_vm1, %v1113_v8  ;;  %v70_v18 = vld.sshfl [vmem:[#allocation1 + $0x28] sm:$0xff pattern:$0x75316420]  ;;  %v72_v19 = vld.sshfl [vmem:[#allocation1 + $0x38] sm:$0xff pattern:$0x75316420] }
   0xe   :  { %1002 = vmatmul.msk.f32.vlgmr.msra.gmra.mxu1 %vm114_vm1, %v1113_v8  ;;  %1007 = vmatpush.msk.msrb.mxu0 %vm118_vm0, %v69_v17  ;;  %75 = vst [vmem:[#allocation1 + $0x20] ss:$2 sm:$0xff] %v23_v11 }
   0xf   :  { %1009 = vmatpush.msk.msrb.mxu1 %vm118_vm0, %v70_v18  ;;  %76 = vst [vmem:[#allocation1 + $0x30] ss:$2 sm:$0xff] %v24_v14  ;;  %1013 = vmatpush.msk.msrb.mxu3 %vm118_vm0, %v72_v19 }
  0x11   :  { %v79_v22 = vld.sshfl [vmem:[#allocation1 + $0x10] sm:$0xff pattern:$0x75316420]  ;;  %v80_v23 = vld.sshfl [vmem:[#allocation1 + $0x18] sm:$0xff pattern:$0x75316420] }
  0x12   :  { %1019 = vmatpush.msk.msra.mxu2 %vm118_vm0, %v79_v22  ;;  %86 = vst [vmem:[#allocation1 + $0x10] ss:$2 sm:$0xff] %v26_v20  ;;  %1021 = vmatpush.msk.msra.mxu3 %vm118_vm0, %v80_v23 }
  0x13   :  { %1012 = vmatmul.msk.f32.vlgmr.msrb.gmra.mxu2 %vm114_vm1, %v1113_v8  ;;  %v77_v25 = vld.sshfl [vmem:[#allocation1] sm:$0xff pattern:$0x75316420]  ;;  %v78_v26 = vld.sshfl [vmem:[#allocation1 + $0x8] sm:$0xff pattern:$0x75316420]  ;;  %1014 = vmatmul.msk.f32.vlgmr.msrb.gmra.mxu3 %vm114_vm1, %v1113_v8 }
  0x14   :  { %1015 = vmatpush.msk.msra.mxu0 %vm118_vm0, %v77_v25  ;;  %85 = vst [vmem:[#allocation1] ss:$2 sm:$0xff] %v25_v21  ;;  %1017 = vmatpush.msk.msra.mxu1 %vm118_vm0, %v78_v26 }
  0x15   :  { %1008 = vmatmul.msk.f32.vlgmr.msrb.gmra.mxu0 %vm114_vm1, %v1113_v8  ;;  %v81_v28 = vld.sshfl [vmem:[#allocation1 + $0x20] sm:$0xff pattern:$0x75316420]  ;;  %v82_v29 = vld.sshfl [vmem:[#allocation1 + $0x28] sm:$0xff pattern:$0x75316420] }
  0x16   :  { %1010 = vmatmul.msk.f32.vlgmr.msrb.gmra.mxu1 %vm114_vm1, %v1113_v8  ;;  %v83_v30 = vld.sshfl [vmem:[#allocation1 + $0x30] sm:$0xff pattern:$0x75316420]  ;;  %1023 = vmatpush.msk.msrb.mxu0 %vm118_vm0, %v81_v28  ;;  %87 = vst [vmem:[#allocation1 + $0x20] ss:$2 sm:$0xff] %v27_v24 }
  0x17   :  { %1027 = vmatpush.msk.msrb.mxu2 %vm118_vm0, %v83_v30  ;;  %1025 = vmatpush.msk.msrb.mxu1 %vm118_vm0, %v82_v29  ;;  %v84_v31 = vld.sshfl [vmem:[#allocation1 + $0x38] sm:$0xff pattern:$0x75316420] }
  0x18   :  { %88 = vst [vmem:[#allocation1 + $0x30] ss:$2 sm:$0xff] %v28_v27  ;;  %1029 = vmatpush.msk.msrb.mxu3 %vm118_vm0, %v84_v31 }
  0x19   :  { %v91_v34 = vld.sshfl [vmem:[#allocation1 + $0x10] sm:$0xff pattern:$0x75316420]  ;;  %v92_v35 = vld.sshfl [vmem:[#allocation1 + $0x18] sm:$0xff pattern:$0x75316420] }
  0x1a   :  { %98 = vst [vmem:[#allocation1 + $0x10] ss:$2 sm:$0xff] %v30_v32 }
  0x1b   :  { %1020 = vmatmul.msk.f32.vlgmr.msra.gmra.mxu2 %vm114_vm1, %v1113_v8  ;;  %1022 = vmatmul.msk.f32.vlgmr.msra.gmra.mxu3 %vm114_vm1, %v1113_v8  ;;  %v89_v37 = vld.sshfl [vmem:[#allocation1] sm:$0xff pattern:$0x75316420]  ;;  %v90_v38 = vld.sshfl [vmem:[#allocation1 + $0x8] sm:$0xff pattern:$0x75316420] }
  0x1c   :  { %1035 = vmatpush.msk.msra.mxu2 %vm118_vm0, %v91_v34  ;;  %97 = vst [vmem:[#allocation1] ss:$2 sm:$0xff] %v29_v33  ;;  %1037 = vmatpush.msk.msra.mxu3 %vm118_vm0, %v92_v35 }
  0x1d   :  { %1016 = vmatmul.msk.f32.vlgmr.msra.gmra.mxu0 %vm114_vm1, %v1113_v8  ;;  %v93_v40 = vld.sshfl [vmem:[#allocation1 + $0x20] sm:$0xff pattern:$0x75316420]  ;;  %v94_v41 = vld.sshfl [vmem:[#allocation1 + $0x28] sm:$0xff pattern:$0x75316420] }
  0x1e   :  { %1018 = vmatmul.msk.f32.vlgmr.msra.gmra.mxu1 %vm114_vm1, %v1113_v8  ;;  %1031 = vmatpush.msk.msra.mxu0 %vm118_vm0, %v89_v37  ;;  %99 = vst [vmem:[#allocation1 + $0x20] ss:$2 sm:$0xff] %v31_v36 }
  0x1f   :  { %1033 = vmatpush.msk.msra.mxu1 %vm118_vm0, %v90_v38  ;;  %v95_v43 = vld.sshfl [vmem:[#allocation1 + $0x30] sm:$0xff pattern:$0x75316420]  ;;  %v96_v44 = vld.sshfl [vmem:[#allocation1 + $0x38] sm:$0xff pattern:$0x75316420] }
  0x20   :  { %100 = vst [vmem:[#allocation1 + $0x30] ss:$2 sm:$0xff] %v32_v39 }
  0x21   :  { %v103_v46 = vld.sshfl [vmem:[#allocation1 + $0x10] sm:$0xff pattern:$0x75316420]  ;;  %v104_v47 = vld.sshfl [vmem:[#allocation1 + $0x18] sm:$0xff pattern:$0x75316420] }
  0x22   :  { %110 = vst [vmem:[#allocation1 + $0x10] ss:$2 sm:$0xff] %v34_v42 }
  0x23   :  { %1028 = vmatmul.msk.f32.vlgmr.msrb.gmra.mxu2 %vm114_vm1, %v1113_v8  ;;  %1030 = vmatmul.msk.f32.vlgmr.msrb.gmra.mxu3 %vm114_vm1, %v1113_v8  ;;  %v101_v48 = vld.sshfl [vmem:[#allocation1] sm:$0xff pattern:$0x75316420]  ;;  %v102_v49 = vld.sshfl [vmem:[#allocation1 + $0x8] sm:$0xff pattern:$0x75316420] }
  0x24   :  { %1043 = vmatpush.msk.msrb.mxu2 %vm118_vm0, %v95_v43  ;;  %1045 = vmatpush.msk.msrb.mxu3 %vm118_vm0, %v96_v44  ;;  %109 = vst [vmem:[#allocation1] ss:$2 sm:$0xff] %v33_v45 }
  0x25   :  { %1024 = vmatmul.msk.f32.vlgmr.msrb.gmra.mxu0 %vm114_vm1, %v1113_v8  ;;  %v105_v52 = vld.sshfl [vmem:[#allocation1 + $0x20] sm:$0xff pattern:$0x75316420]  ;;  %v106_v53 = vld.sshfl [vmem:[#allocation1 + $0x28] sm:$0xff pattern:$0x75316420] }
  0x26   :  { %1026 = vmatmul.msk.f32.vlgmr.msrb.gmra.mxu1 %vm114_vm1, %v1113_v8  ;;  %1039 = vmatpush.msk.msrb.mxu0 %vm118_vm0, %v93_v40 }
  0x27   :  { %1041 = vmatpush.msk.msrb.mxu1 %vm118_vm0, %v94_v41  ;;  %v107_v50 = vld.sshfl [vmem:[#allocation1 + $0x30] sm:$0xff pattern:$0x75316420]  ;;  %v108_v51 = vld.sshfl [vmem:[#allocation1 + $0x38] sm:$0xff pattern:$0x75316420] }
  0x29   :  { %v113_v54 = vld.sshfl [vmem:[#allocation1 + $0x10] sm:$0xff pattern:$0x75316420] }
  0x2b   :  { %1036 = vmatmul.msk.f32.vlgmr.msra.gmra.mxu2 %vm114_vm1, %v1113_v8  ;;  %1038 = vmatmul.msk.f32.vlgmr.msra.gmra.mxu3 %vm114_vm1, %v1113_v8  ;;  %v111_v55 = vld.sshfl [vmem:[#allocation1] sm:$0xff pattern:$0x75316420]  ;;  %v112_v56 = vld.sshfl [vmem:[#allocation1 + $0x8] sm:$0xff pattern:$0x75316420] }
  0x2c   :  { %1051 = vmatpush.msk.msra.mxu2 %vm118_vm0, %v103_v46  ;;  %1053 = vmatpush.msk.msra.mxu3 %vm118_vm0, %v104_v47 }
  0x2d   :  { %1032 = vmatmul.msk.f32.vlgmr.msra.gmra.mxu0 %vm114_vm1, %v1113_v8 }
  0x2e   :  { %1034 = vmatmul.msk.f32.vlgmr.msra.gmra.mxu1 %vm114_vm1, %v1113_v8  ;;  %1047 = vmatpush.msk.msra.mxu0 %vm118_vm0, %v101_v48 }
  0x2f   :  { %1049 = vmatpush.msk.msra.mxu1 %vm118_vm0, %v102_v49 }
  0x33   :  { %1044 = vmatmul.msk.f32.vlgmr.msrb.gmra.mxu2 %vm114_vm1, %v1113_v8  ;;  %1046 = vmatmul.msk.f32.vlgmr.msrb.gmra.mxu3 %vm114_vm1, %v1113_v8 }
  0x34   :  { %1059 = vmatpush.msk.msrb.mxu2 %vm118_vm0, %v107_v50  ;;  %1061 = vmatpush.msk.msrb.mxu3 %vm118_vm0, %v108_v51 }
  0x35   :  { %1040 = vmatmul.msk.f32.vlgmr.msrb.gmra.mxu0 %vm114_vm1, %v1113_v8 }
  0x36   :  { %1042 = vmatmul.msk.f32.vlgmr.msrb.gmra.mxu1 %vm114_vm1, %v1113_v8  ;;  %1055 = vmatpush.msk.msrb.mxu0 %vm118_vm0, %v105_v52 }
  0x37   :  { %1057 = vmatpush.msk.msrb.mxu1 %vm118_vm0, %v106_v53 }
  0x3b   :  { %1052 = vmatmul.msk.f32.vlgmr.msra.gmra.mxu2 %vm114_vm1, %v1113_v8  ;;  %1054 = vmatmul.msk.f32.vlgmr.msra.gmra.mxu3 %vm114_vm1, %v1113_v8 }
  0x3c   :  { %1067 = vmatpush.msk.msra.mxu2 %vm118_vm0, %v113_v54 }
  0x3d   :  { %1048 = vmatmul.msk.f32.vlgmr.msra.gmra.mxu0 %vm114_vm1, %v1113_v8 }
  0x3e   :  { %1050 = vmatmul.msk.f32.vlgmr.msra.gmra.mxu1 %vm114_vm1, %v1113_v8  ;;  %1063 = vmatpush.msk.msra.mxu0 %vm118_vm0, %v111_v55 }
  0x3f   :  { %1065 = vmatpush.msk.msra.mxu1 %vm118_vm0, %v112_v56 }
  0x43   :  { %1060 = vmatmul.msk.f32.vlgmr.msrb.gmra.mxu2 %vm114_vm1, %v1113_v8  ;;  %1062 = vmatmul.msk.f32.vlgmr.msrb.gmra.mxu3 %vm114_vm1, %v1113_v8 }
  0x45   :  { %1056 = vmatmul.msk.f32.vlgmr.msrb.gmra.mxu0 %vm114_vm1, %v1113_v8 }
  0x46   :  { %1058 = vmatmul.msk.f32.vlgmr.msrb.gmra.mxu1 %vm114_vm1, %v1113_v8 }
  0x4b   :  { %1068 = vmatmul.msk.f32.vlgmr.msra.gmra.mxu2 %vm114_vm1, %v1113_v8 }
  0x4d   :  { %1064 = vmatmul.msk.f32.vlgmr.msra.gmra.mxu0 %vm114_vm1, %v1113_v8 }
  0x4e   :  { %1066 = vmatmul.msk.f32.vlgmr.msra.gmra.mxu1 %vm114_vm1, %v1113_v8 }
  0x77   :  { %v1259_v57 = vpop.permute.xlu0 %37 }
  0x8a   :  { %v206_v58 = vpop.f32.mrf.mxu0 }
  0x8b   :  { %v207_v59 = vadd.f32 %v206_v58, %v1259_v57  ;;  %v226_v60 = vpop.f32.mrf.mxu1 }
  0x8c   :  { %v227_v61 = vadd.f32 %v226_v60, %v1259_v57 }
  0x8d   :  { %v889_v62 = vmax.f32 %v207_v59, 6.0 }
  0x8e   :  { %v890_v63 = vmax.f32 %v227_v61, 6.0  ;;  %v246_v0 = vpop.f32.mrf.mxu2  ;;  %v266_v1 = vpop.f32.mrf.mxu3 }
  0x8f   :  { %v924_v2 = vmul.f32 0.16666667, %v889_v62  ;;  %v247_v3 = vadd.f32 %v246_v0, %v1259_v57  ;;  %v267_v4 = vadd.f32 %v266_v1, %v1259_v57 }
  0x90   :  { %v925_v5 = vmul.f32 0.16666667, %v890_v63 }
  0x91   :  { %959 = vst [vmem:[%s1404_s3] sm:$0xff] %v924_v2  ;;  %v891_v6 = vmax.f32 %v247_v3, 6.0  ;;  %v892_v7 = vmax.f32 %v267_v4, 6.0 }
  0x92   :  { %960 = vst [vmem:[%s1404_s3 + $0x8] sm:$0xff] %v925_v5  ;;  %v286_v8 = vpop.f32.mrf.mxu0 }
  0x93   :  { %v926_v9 = vmul.f32 0.16666667, %v891_v6  ;;  %v927_v10 = vmul.f32 0.16666667, %v892_v7  ;;  %v287_v11 = vadd.f32 %v286_v8, %v1259_v57  ;;  %v306_v12 = vpop.f32.mrf.mxu1 }
  0x94   :  { %v307_v13 = vadd.f32 %v306_v12, %v1259_v57 }
  0x95   :  { %961 = vst [vmem:[%s1404_s3 + $0x10] sm:$0xff] %v926_v9  ;;  %v893_v14 = vmax.f32 %v287_v11, 6.0 }
  0x96   :  { %962 = vst [vmem:[%s1404_s3 + $0x18] sm:$0xff] %v927_v10  ;;  %v894_v15 = vmax.f32 %v307_v13, 6.0  ;;  %v326_v16 = vpop.f32.mrf.mxu2  ;;  %v346_v17 = vpop.f32.mrf.mxu3 }
  0x97   :  { %v928_v18 = vmul.f32 0.16666667, %v893_v14  ;;  %v327_v19 = vadd.f32 %v326_v16, %v1259_v57  ;;  %v347_v20 = vadd.f32 %v346_v17, %v1259_v57 }
  0x98   :  { %v929_v21 = vmul.f32 0.16666667, %v894_v15 }
  0x99   :  { %963 = vst [vmem:[%s1404_s3 + $0x20] sm:$0xff] %v928_v18  ;;  %v895_v22 = vmax.f32 %v327_v19, 6.0  ;;  %v896_v23 = vmax.f32 %v347_v20, 6.0 }
  0x9a   :  { %964 = vst [vmem:[%s1404_s3 + $0x28] sm:$0xff] %v929_v21  ;;  %v366_v24 = vpop.f32.mrf.mxu0 }
  0x9b   :  { %v930_v25 = vmul.f32 0.16666667, %v895_v22  ;;  %v931_v26 = vmul.f32 0.16666667, %v896_v23  ;;  %v367_v27 = vadd.f32 %v366_v24, %v1259_v57  ;;  %v386_v28 = vpop.f32.mrf.mxu1 }
  0x9c   :  { %v387_v29 = vadd.f32 %v386_v28, %v1259_v57 }
  0x9d   :  { %965 = vst [vmem:[%s1404_s3 + $0x30] sm:$0xff] %v930_v25  ;;  %v897_v30 = vmax.f32 %v367_v27, 6.0 }
  0x9e   :  { %966 = vst [vmem:[%s1404_s3 + $0x38] sm:$0xff] %v931_v26  ;;  %v898_v31 = vmax.f32 %v387_v29, 6.0  ;;  %v406_v32 = vpop.f32.mrf.mxu2  ;;  %v426_v33 = vpop.f32.mrf.mxu3 }
  0x9f   :  { %v932_v34 = vmul.f32 0.16666667, %v897_v30  ;;  %v407_v35 = vadd.f32 %v406_v32, %v1259_v57  ;;  %v427_v36 = vadd.f32 %v426_v33, %v1259_v57 }
  0xa0   :  { %v933_v37 = vmul.f32 0.16666667, %v898_v31 }
  0xa1   :  { %967 = vst [vmem:[%s1404_s3 + $0x40] sm:$0xff] %v932_v34  ;;  %v899_v38 = vmax.f32 %v407_v35, 6.0  ;;  %v900_v39 = vmax.f32 %v427_v36, 6.0 }
  0xa2   :  { %968 = vst [vmem:[%s1404_s3 + $0x48] sm:$0xff] %v933_v37  ;;  %v446_v40 = vpop.f32.mrf.mxu0 }
  0xa3   :  { %v934_v41 = vmul.f32 0.16666667, %v899_v38  ;;  %v935_v42 = vmul.f32 0.16666667, %v900_v39  ;;  %v447_v43 = vadd.f32 %v446_v40, %v1259_v57  ;;  %v466_v44 = vpop.f32.mrf.mxu1 }
  0xa4   :  { %v467_v45 = vadd.f32 %v466_v44, %v1259_v57 }
  0xa5   :  { %969 = vst [vmem:[%s1404_s3 + $0x50] sm:$0xff] %v934_v41  ;;  %v901_v46 = vmax.f32 %v447_v43, 6.0 }
  0xa6   :  { %970 = vst [vmem:[%s1404_s3 + $0x58] sm:$0xff] %v935_v42  ;;  %v902_v47 = vmax.f32 %v467_v45, 6.0  ;;  %v486_v48 = vpop.f32.mrf.mxu2  ;;  %v506_v49 = vpop.f32.mrf.mxu3 }
  0xa7   :  { %v936_v50 = vmul.f32 0.16666667, %v901_v46  ;;  %v487_v51 = vadd.f32 %v486_v48, %v1259_v57  ;;  %v507_v52 = vadd.f32 %v506_v49, %v1259_v57 }
  0xa8   :  { %v937_v53 = vmul.f32 0.16666667, %v902_v47 }
  0xa9   :  { %971 = vst [vmem:[%s1404_s3 + $0x60] sm:$0xff] %v936_v50  ;;  %v903_v54 = vmax.f32 %v487_v51, 6.0  ;;  %v904_v55 = vmax.f32 %v507_v52, 6.0 }
  0xaa   :  { %972 = vst [vmem:[%s1404_s3 + $0x68] sm:$0xff] %v937_v53  ;;  %v526_v56 = vpop.f32.mrf.mxu0 }
  0xab   :  { %v938_v58 = vmul.f32 0.16666667, %v903_v54  ;;  %v939_v59 = vmul.f32 0.16666667, %v904_v55  ;;  %v527_v60 = vadd.f32 %v526_v56, %v1259_v57  ;;  %v546_v61 = vpop.f32.mrf.mxu1 }
  0xac   :  { %v547_v62 = vadd.f32 %v546_v61, %v1259_v57 }
  0xad   :  { %973 = vst [vmem:[%s1404_s3 + $0x70] sm:$0xff] %v938_v58  ;;  %v905_v63 = vmax.f32 %v527_v60, 6.0 }
  0xae   :  { %974 = vst [vmem:[%s1404_s3 + $0x78] sm:$0xff] %v939_v59  ;;  %v906_v0 = vmax.f32 %v547_v62, 6.0  ;;  %v566_v1 = vpop.f32.mrf.mxu2  ;;  %v586_v2 = vpop.f32.mrf.mxu3 }
  0xaf   :  { %v940_v3 = vmul.f32 0.16666667, %v905_v63  ;;  %v567_v4 = vadd.f32 %v566_v1, %v1259_v57  ;;  %v587_v5 = vadd.f32 %v586_v2, %v1259_v57 }
  0xb0   :  { %v941_v6 = vmul.f32 0.16666667, %v906_v0 }
  0xb1   :  { %975 = vst [vmem:[%s1404_s3 + $0x80] sm:$0xff] %v940_v3  ;;  %v907_v7 = vmax.f32 %v567_v4, 6.0  ;;  %v908_v8 = vmax.f32 %v587_v5, 6.0 }
  0xb2   :  { %976 = vst [vmem:[%s1404_s3 + $0x88] sm:$0xff] %v941_v6  ;;  %v606_v9 = vpop.f32.mrf.mxu0 }
  0xb3   :  { %v942_v10 = vmul.f32 0.16666667, %v907_v7  ;;  %v943_v11 = vmul.f32 0.16666667, %v908_v8  ;;  %v607_v12 = vadd.f32 %v606_v9, %v1259_v57  ;;  %v626_v13 = vpop.f32.mrf.mxu1 }
  0xb4   :  { %v627_v14 = vadd.f32 %v626_v13, %v1259_v57 }
  0xb5   :  { %977 = vst [vmem:[%s1404_s3 + $0x90] sm:$0xff] %v942_v10  ;;  %v909_v15 = vmax.f32 %v607_v12, 6.0 }
  0xb6   :  { %978 = vst [vmem:[%s1404_s3 + $0x98] sm:$0xff] %v943_v11  ;;  %v910_v16 = vmax.f32 %v627_v14, 6.0  ;;  %v646_v17 = vpop.f32.mrf.mxu2  ;;  %v666_v18 = vpop.f32.mrf.mxu3 }
  0xb7   :  { %v944_v19 = vmul.f32 0.16666667, %v909_v15  ;;  %v647_v20 = vadd.f32 %v646_v17, %v1259_v57  ;;  %v667_v21 = vadd.f32 %v666_v18, %v1259_v57 }
  0xb8   :  { %v945_v22 = vmul.f32 0.16666667, %v910_v16 }
  0xb9   :  { %979 = vst [vmem:[%s1404_s3 + $0xa0] sm:$0xff] %v944_v19  ;;  %v911_v23 = vmax.f32 %v647_v20, 6.0  ;;  %v912_v24 = vmax.f32 %v667_v21, 6.0 }
  0xba   :  { %980 = vst [vmem:[%s1404_s3 + $0xa8] sm:$0xff] %v945_v22  ;;  %v686_v25 = vpop.f32.mrf.mxu0 }
  0xbb   :  { %v946_v26 = vmul.f32 0.16666667, %v911_v23  ;;  %v947_v27 = vmul.f32 0.16666667, %v912_v24  ;;  %v687_v28 = vadd.f32 %v686_v25, %v1259_v57  ;;  %v706_v29 = vpop.f32.mrf.mxu1 }
  0xbc   :  { %v707_v30 = vadd.f32 %v706_v29, %v1259_v57 }
  0xbd   :  { %981 = vst [vmem:[%s1404_s3 + $0xb0] sm:$0xff] %v946_v26  ;;  %v913_v31 = vmax.f32 %v687_v28, 6.0 }
  0xbe   :  { %982 = vst [vmem:[%s1404_s3 + $0xb8] sm:$0xff] %v947_v27  ;;  %v914_v32 = vmax.f32 %v707_v30, 6.0  ;;  %v726_v33 = vpop.f32.mrf.mxu2  ;;  %v746_v34 = vpop.f32.mrf.mxu3 }
  0xbf   :  { %v948_v35 = vmul.f32 0.16666667, %v913_v31  ;;  %v727_v36 = vadd.f32 %v726_v33, %v1259_v57  ;;  %v747_v37 = vadd.f32 %v746_v34, %v1259_v57 }
  0xc0   :  { %v949_v38 = vmul.f32 0.16666667, %v914_v32 }
  0xc1   :  { %983 = vst [vmem:[%s1404_s3 + $0xc0] sm:$0xff] %v948_v35  ;;  %v915_v39 = vmax.f32 %v727_v36, 6.0  ;;  %v916_v40 = vmax.f32 %v747_v37, 6.0 }
  0xc2   :  { %984 = vst [vmem:[%s1404_s3 + $0xc8] sm:$0xff] %v949_v38  ;;  %v766_v41 = vpop.f32.mrf.mxu0 }
  0xc3   :  { %v950_v42 = vmul.f32 0.16666667, %v915_v39  ;;  %v951_v43 = vmul.f32 0.16666667, %v916_v40  ;;  %v767_v44 = vadd.f32 %v766_v41, %v1259_v57  ;;  %v786_v45 = vpop.f32.mrf.mxu1 }
  0xc4   :  { %v787_v46 = vadd.f32 %v786_v45, %v1259_v57 }
  0xc5   :  { %985 = vst [vmem:[%s1404_s3 + $0xd0] sm:$0xff] %v950_v42  ;;  %v917_v47 = vmax.f32 %v767_v44, 6.0 }
  0xc6   :  { %986 = vst [vmem:[%s1404_s3 + $0xd8] sm:$0xff] %v951_v43  ;;  %v918_v48 = vmax.f32 %v787_v46, 6.0  ;;  %v806_v49 = vpop.f32.mrf.mxu2  ;;  %v826_v50 = vpop.f32.mrf.mxu3 }
  0xc7   :  { %v952_v51 = vmul.f32 0.16666667, %v917_v47  ;;  %v807_v52 = vadd.f32 %v806_v49, %v1259_v57  ;;  %v827_v53 = vadd.f32 %v826_v50, %v1259_v57 }
  0xc8   :  { %v953_v54 = vmul.f32 0.16666667, %v918_v48 }
  0xc9   :  { %987 = vst [vmem:[%s1404_s3 + $0xe0] sm:$0xff] %v952_v51  ;;  %v919_v55 = vmax.f32 %v807_v52, 6.0  ;;  %v920_v56 = vmax.f32 %v827_v53, 6.0 }
  0xca   :  { %988 = vst [vmem:[%s1404_s3 + $0xe8] sm:$0xff] %v953_v54  ;;  %v846_v58 = vpop.f32.mrf.mxu0 }
  0xcb   :  { %v954_v59 = vmul.f32 0.16666667, %v919_v55  ;;  %v955_v60 = vmul.f32 0.16666667, %v920_v56  ;;  %v847_v61 = vadd.f32 %v846_v58, %v1259_v57  ;;  %v866_v62 = vpop.f32.mrf.mxu1 }
  0xcc   :  { %v867_v63 = vadd.f32 %v866_v62, %v1259_v57 }
  0xcd   :  { %989 = vst [vmem:[%s1404_s3 + $0xf0] sm:$0xff] %v954_v59  ;;  %v921_v0 = vmax.f32 %v847_v61, 6.0 }
  0xce   :  { %990 = vst [vmem:[%s1404_s3 + $0xf8] sm:$0xff] %v955_v60  ;;  %v922_v1 = vmax.f32 %v867_v63, 6.0  ;;  %v886_v2 = vpop.f32.mrf.mxu2 }
  0xcf   :  { %v956_v3 = vmul.f32 0.16666667, %v921_v0  ;;  %v887_v4 = vadd.f32 %v886_v2, %v1259_v57 }
  0xd0   :  { %v957_v5 = vmul.f32 0.16666667, %v922_v1 }
  0xd1   :  { %991 = vst [vmem:[%s1404_s3 + $0x100] sm:$0xff] %v956_v3  ;;  %v923_v6 = vmax.f32 %v887_v4, 6.0 }
  0xd2   :  { %992 = vst [vmem:[%s1404_s3 + $0x108] sm:$0xff] %v957_v5 }
  0xd3   :  { %v958_v7 = vmul.f32 0.16666667, %v923_v6 }
  0xd5   :  { %994 = vst.msk [vmem:[%s1404_s3 + $0x110] sm:$0xff] %vm993_vm2, %v958_v7 }

</bundles_post_ra>
